<compile_context>
chip_gen: v7x
topology: tpu7x:2x2x1
jax: 0.10.0
libtpu: 0.0.40
codegen_flags: <defaults>
</compile_context>

<pallas_src>
import jax
import jax.numpy as jnp
from jax.experimental import pallas as pl
from jax.experimental.pallas import tpu as pltpu

H = W = 7
HB = WB = 9           # zero-bordered spatial grid (7x7 image at rows/cols 1..7)
HWB = HB * WB         # 81 bordered pixels
NLANE = 128           # lane-padded pixel axis (full vreg lane width)
C_IN = 128
C_OUT = 32
KH = KW = 3
NTAP = KH * KW


def conv3x3_kernel(x_ref, w_ref, o_ref):
    """3x3 stride-1 'same' conv on a 7x7 image, bordered NCHW-native layout.

    x_ref: (C_IN, NLANE)    channels on sublanes; lane q = r*9 + c holds the
                            zero-bordered pixel (r, c); lanes [81,128) are zero
    w_ref: (9*C_OUT, C_IN)  row = (kh*3 + kw) * C_OUT + cout
    o_ref: (C_OUT, NLANE)   lane-dense output; valid conv results live at
                            lanes (ho+1)*9 + (wo+1) for ho, wo in [0, 7)
    """
    # Single wide matmul, all 9 taps at once: (288,128) @ (128,128) -> (288,128).
    y = jnp.dot(w_ref[...], x_ref[...], preferred_element_type=jnp.float32)

    # Per-tap spatial shift via lane rolls (XLU slot, otherwise idle).  Because
    # the image sits inside a zero border, every source lane a valid output
    # lane pulls from is either a real pixel or a border/pad zero -> no masks.
    # Three independent accumulator chains keep the VPU adds overlappable.
    accs = [None, None, None]
    for kh in range(KH):
        for kw in range(KW):
            tap = kh * KW + kw
            # 8-aligned (multiple-of-32) sublane slice: no relayout.
            y_tap = y[tap * C_OUT:(tap + 1) * C_OUT, :]
            delta = (kh - 1) * WB + (kw - 1)
            if delta != 0:
                # rolled[:, q] = y_tap[:, (q + delta) % 128]  (XLU lane rotate)
                y_tap = pltpu.roll(y_tap, shift=(-delta) % NLANE, axis=1)
            i = tap % 3
            accs[i] = y_tap if accs[i] is None else accs[i] + y_tap
    # Full lane-dense store (unmasked vst); wrapper slices the valid pixels.
    o_ref[...] = (accs[0] + accs[1]) + accs[2]


def pack_conv_weight(w_oihw):
    """OIHW (32,128,3,3) -> tap-major (288,128); row = tap*C_OUT + cout.
    Call ONCE at parameter init (not per forward)."""
    return jnp.transpose(w_oihw, (2, 3, 0, 1)).reshape(NTAP * C_OUT, C_IN)


def conv2d_163(x_nchw, w_packed):
    """PyTorch Conv2d(128, 32, kernel=3, stride=1, padding=1, bias=False).

    x_nchw:   (1, 128, 7, 7) f32
    w_packed: (288, 128) f32 (pre-packed via pack_conv_weight)
    returns   (1, 32, 7, 7) f32
    """
    # Zero-bordered 9x9 layout, flattened onto lanes, lane-padded to 128.
    x_b = jnp.pad(x_nchw.reshape(C_IN, H, W), ((0, 0), (1, 1), (1, 1)))
    x_flat = jnp.pad(x_b.reshape(C_IN, HWB), ((0, 0), (0, NLANE - HWB)))

    out = pl.pallas_call(
        conv3x3_kernel,
        out_shape=jax.ShapeDtypeStruct((C_OUT, NLANE), jnp.float32),
        in_specs=[
            pl.BlockSpec(memory_space=pltpu.MemorySpace.VMEM),
            pl.BlockSpec(memory_space=pltpu.MemorySpace.VMEM),
        ],
        out_specs=pl.BlockSpec(memory_space=pltpu.MemorySpace.VMEM),
    )(x_flat, w_packed)

    # Extract the 7x7 interior of the bordered grid (fuses into the concat copy).
    return out[:, :HWB].reshape(C_OUT, HB, WB)[:, 1:1 + H, 1:1 + W] \
              .reshape(1, C_OUT, H, W)


def forward(params, x578, x481, x488, x495, x502, x509, x516, x523,
            x530, x537, x544, x551, x558, x565, x572, x586):
    """Mirrors M.forward: conv on x578, then channel-dim concat (axis=1)."""
    x579 = conv2d_163(x578, params["conv2d163_weight_packed"])
    x587 = jnp.concatenate(
        [x481, x488, x495, x502, x509, x516, x523, x530,
         x537, x544, x551, x558, x565, x572, x579, x586], axis=1)
    return x587


if __name__ == "__main__":
    key = jax.random.PRNGKey(0)
    keys = jax.random.split(key, 20)

    # Deterministic parameter init (shape from Conv2d(128, 32, 3, 3)).
    w = jax.random.normal(keys[0], (C_OUT, C_IN, 3, 3), jnp.float32) * 0.05
    # Weight packing hoisted out of the per-call path (perf review item 1).
    params = {"conv2d163_weight_packed": pack_conv_weight(w)}

    # Inputs at the shapes the module's forward implies (already small).
    x481 = jax.random.normal(keys[1], (1, 896, 7, 7), jnp.float32)
    x488 = jax.random.normal(keys[2], (1, 32, 7, 7), jnp.float32)
    x495 = jax.random.normal(keys[3], (1, 32, 7, 7), jnp.float32)
    x502 = jax.random.normal(keys[4], (1, 32, 7, 7), jnp.float32)
    x509 = jax.random.normal(keys[5], (1, 32, 7, 7), jnp.float32)
    x516 = jax.random.normal(keys[6], (1, 32, 7, 7), jnp.float32)
    x523 = jax.random.normal(keys[7], (1, 32, 7, 7), jnp.float32)
    x530 = jax.random.normal(keys[8], (1, 32, 7, 7), jnp.float32)
    x537 = jax.random.normal(keys[9], (1, 32, 7, 7), jnp.float32)
    x544 = jax.random.normal(keys[10], (1, 32, 7, 7), jnp.float32)
    x551 = jax.random.normal(keys[11], (1, 32, 7, 7), jnp.float32)
    x558 = jax.random.normal(keys[12], (1, 32, 7, 7), jnp.float32)
    x565 = jax.random.normal(keys[13], (1, 32, 7, 7), jnp.float32)
    x572 = jax.random.normal(keys[14], (1, 32, 7, 7), jnp.float32)
    x578 = jax.random.normal(keys[15], (1, 128, 7, 7), jnp.float32)
    x586 = jax.random.normal(keys[16], (1, 32, 7, 7), jnp.float32)

    out = jax.jit(forward)(params, x578, x481, x488, x495, x502, x509, x516,
                           x523, x530, x537, x544, x551, x558, x565, x572,
                           x586)
    out = jax.block_until_ready(out)
    assert out.shape == (1, 1376, 7, 7), out.shape

    # Sanity-check the Pallas conv against lax's reference conv.
    ref_conv = jax.lax.conv_general_dilated(
        x578, w, window_strides=(1, 1), padding=((1, 1), (1, 1)),
        dimension_numbers=("NCHW", "OIHW", "NCHW"))
    pallas_conv = jax.block_until_ready(
        conv2d_163(x578, params["conv2d163_weight_packed"]))
    assert jnp.allclose(pallas_conv, ref_conv, atol=1e-4, rtol=1e-4)

    print("KERNEL_OK")
</pallas_src>

<mosaic_0001>
module attributes {stable_mosaic.version = 11 : i64} {
  func.func @conv3x3_kernel(%arg0: memref<128x128xf32, #tpu.memory_space<vmem>>, %arg1: memref<288x128xf32, #tpu.memory_space<vmem>>, %arg2: memref<32x128xf32, #tpu.memory_space<vmem>>) attributes {dimension_semantics = [], scalar_prefetch = 0 : i64, scratch_operands = 0 : i64, tpu.core_type = #tpu.core_type<tc>} {
    %c0 = arith.constant 0 : index
    %c0_0 = arith.constant 0 : index
    %0 = vector.load %arg1[%c0, %c0_0] : memref<288x128xf32, #tpu.memory_space<vmem>>, vector<288x128xf32>
    %c0_1 = arith.constant 0 : index
    %c0_2 = arith.constant 0 : index
    %1 = vector.load %arg0[%c0_1, %c0_2] : memref<128x128xf32, #tpu.memory_space<vmem>>, vector<128x128xf32>
    %cst = arith.constant dense<0.000000e+00> : vector<288x128xf32>
    %2 = tpu.matmul %0, %1, %cst {dimension_numbers = #tpu.dot_dimension_numbers<[1], [0], [0], [1], [0, 0, 1, 1], [], []>} : vector<288x128xf32>, vector<128x128xf32>, vector<288x128xf32> -> vector<288x128xf32>
    %3 = vector.extract_strided_slice %2 {offsets = [0, 0], sizes = [32, 128], strides = [1, 1]} : vector<288x128xf32> to vector<32x128xf32>
    %c10_i32 = arith.constant 10 : i32
    %4 = tpu.dynamic_rotate %3 by %c10_i32 dim 1 : vector<32x128xf32>, i32 -> vector<32x128xf32>
    %5 = vector.extract_strided_slice %2 {offsets = [32, 0], sizes = [32, 128], strides = [1, 1]} : vector<288x128xf32> to vector<32x128xf32>
    %c9_i32 = arith.constant 9 : i32
    %6 = tpu.dynamic_rotate %5 by %c9_i32 dim 1 : vector<32x128xf32>, i32 -> vector<32x128xf32>
    %7 = vector.extract_strided_slice %2 {offsets = [64, 0], sizes = [32, 128], strides = [1, 1]} : vector<288x128xf32> to vector<32x128xf32>
    %c8_i32 = arith.constant 8 : i32
    %8 = tpu.dynamic_rotate %7 by %c8_i32 dim 1 : vector<32x128xf32>, i32 -> vector<32x128xf32>
    %9 = vector.extract_strided_slice %2 {offsets = [96, 0], sizes = [32, 128], strides = [1, 1]} : vector<288x128xf32> to vector<32x128xf32>
    %c1_i32 = arith.constant 1 : i32
    %10 = tpu.dynamic_rotate %9 by %c1_i32 dim 1 : vector<32x128xf32>, i32 -> vector<32x128xf32>
    %11 = arith.addf %4, %10 : vector<32x128xf32>
    %12 = vector.extract_strided_slice %2 {offsets = [128, 0], sizes = [32, 128], strides = [1, 1]} : vector<288x128xf32> to vector<32x128xf32>
    %13 = arith.addf %6, %12 : vector<32x128xf32>
    %14 = vector.extract_strided_slice %2 {offsets = [160, 0], sizes = [32, 128], strides = [1, 1]} : vector<288x128xf32> to vector<32x128xf32>
    %c127_i32 = arith.constant 127 : i32
    %15 = tpu.dynamic_rotate %14 by %c127_i32 dim 1 : vector<32x128xf32>, i32 -> vector<32x128xf32>
    %16 = arith.addf %8, %15 : vector<32x128xf32>
    %17 = vector.extract_strided_slice %2 {offsets = [192, 0], sizes = [32, 128], strides = [1, 1]} : vector<288x128xf32> to vector<32x128xf32>
    %c120_i32 = arith.constant 120 : i32
    %18 = tpu.dynamic_rotate %17 by %c120_i32 dim 1 : vector<32x128xf32>, i32 -> vector<32x128xf32>
    %19 = arith.addf %11, %18 : vector<32x128xf32>
    %20 = vector.extract_strided_slice %2 {offsets = [224, 0], sizes = [32, 128], strides = [1, 1]} : vector<288x128xf32> to vector<32x128xf32>
    %c119_i32 = arith.constant 119 : i32
    %21 = tpu.dynamic_rotate %20 by %c119_i32 dim 1 : vector<32x128xf32>, i32 -> vector<32x128xf32>
    %22 = arith.addf %13, %21 : vector<32x128xf32>
    %23 = vector.extract_strided_slice %2 {offsets = [256, 0], sizes = [32, 128], strides = [1, 1]} : vector<288x128xf32> to vector<32x128xf32>
    %c118_i32 = arith.constant 118 : i32
    %24 = tpu.dynamic_rotate %23 by %c118_i32 dim 1 : vector<32x128xf32>, i32 -> vector<32x128xf32>
    %25 = arith.addf %16, %24 : vector<32x128xf32>
    %26 = arith.addf %19, %22 : vector<32x128xf32>
    %27 = arith.addf %26, %25 : vector<32x128xf32>
    %c0_3 = arith.constant 0 : index
    %c0_4 = arith.constant 0 : index
    %28 = vector.load %arg2[%c0_3, %c0_4] : memref<32x128xf32, #tpu.memory_space<vmem>>, vector<32x128xf32>
    tpu.vector_store %arg2[%c0_3, %c0_4], %27 {strides = array<i32>} : memref<32x128xf32, #tpu.memory_space<vmem>>, vector<32x128xf32>,
    return
  }
}

</mosaic_0001>

<bundles_post_ra>
// kernel: forward.1
= control target key start
LH: loop header
LB: loop body
LE: loop exit
PB: predicated region body
PF: predicated region fallthrough
CT: control target
= control target key end

     0   :  { %s606_s26 = smov 10   ;;  %s607_s27 = smov 127   ;;  %s803_s0 = inlined_call_operand.vmem [shape: f32[128,128], index: 0, kind: input, shape index: {}]   ;;  %s804_s1 = inlined_call_operand.vmem [shape: f32[288,128], index: 1, kind: input, shape index: {}]   ;;  %s805_s2 = inlined_call_operand.vmem [shape: f32[32,128], index: 2, kind: output, shape index: {}]  }
   0x1   :  { %v47_v0 = vld [vmem:[%s803_s0] sm:$0xff]  ;;  %v48_v1 = vld [vmem:[%s803_s0 + $0x8] sm:$0xff]  ;;  %v49_v2 = vld [vmem:[%s803_s0 + $0x10] sm:$0xff]  ;;  %s609_s28 = smov 120   ;;  %s610_s29 = smov 8  }
   0x2   :  { %v550_v3 = vpack.c.bf16 %v48_v1, %v47_v0  ;;  %v50_v4 = vld [vmem:[%s803_s0 + $0x18] sm:$0xff]  ;;  %v51_v6 = vld [vmem:[%s803_s0 + $0x20] sm:$0xff]  ;;  %v52_v7 = vld [vmem:[%s803_s0 + $0x28] sm:$0xff]  ;;  %s611_s30 = smov 119   ;;  %s612_s3 = smov 1  }
   0x3   :  { %v554_v5 = vpack.c.bf16 %v50_v4, %v49_v2  ;;  %v558_v8 = vpack.c.bf16 %v52_v7, %v51_v6  ;;  %v11_v9 = vld [vmem:[%s804_s1] sm:$0xff]  ;;  %v53_v10 = vld [vmem:[%s803_s0 + $0x30] sm:$0xff]  ;;  %v54_v11 = vld [vmem:[%s803_s0 + $0x38] sm:$0xff]  ;;  %s613_s4 = smov 118  }
   0x4   :  { %551 = vmatprep.subr.bf16.mxu0 %v550_v3  ;;  %582 = vmatprep.subr.bf16.mxu1 %v550_v3  ;;  %v29_v12 = vld [vmem:[%s804_s1 + $0x90] sm:$0xff]  ;;  %v562_v13 = vpack.c.bf16 %v54_v11, %v53_v10  ;;  %v55_v14 = vld [vmem:[%s803_s0 + $0x40] sm:$0xff]  ;;  %v56_v15 = vld [vmem:[%s803_s0 + $0x48] sm:$0xff] }
   0x5   :  { %553 = vmatpush3.bf16.msra.mxu0 %v550_v3  ;;  %590 = vmatpush3.bf16.msra.mxu1 %v550_v3  ;;  %v566_v16 = vpack.c.bf16 %v56_v15, %v55_v14  ;;  %v57_v17 = vld [vmem:[%s803_s0 + $0x50] sm:$0xff]  ;;  %v58_v18 = vld [vmem:[%s803_s0 + $0x58] sm:$0xff]  ;;  %v59_v20 = vld [vmem:[%s803_s0 + $0x60] sm:$0xff] }
   0x6   :  { %555 = vmatprep.subr.bf16.mxu0 %v554_v5  ;;  %583 = vmatprep.subr.bf16.mxu1 %v554_v5  ;;  %v570_v19 = vpack.c.bf16 %v58_v18, %v57_v17  ;;  %v60_v21 = vld [vmem:[%s803_s0 + $0x68] sm:$0xff]  ;;  %v61_v23 = vld [vmem:[%s803_s0 + $0x70] sm:$0xff]  ;;  %v62_v24 = vld [vmem:[%s803_s0 + $0x78] sm:$0xff] }
   0x7   :  { %496 = vmatprep.mubr.f32.mxu0 %v11_v9  ;;  %523 = vmatprep.mubr.f32.mxu1 %v29_v12  ;;  %v574_v22 = vpack.c.bf16 %v60_v21, %v59_v20  ;;  %v578_v25 = vpack.c.bf16 %v62_v24, %v61_v23  ;;  %v12_v26 = vld [vmem:[%s804_s1 + $0x8] sm:$0xff]  ;;  %v30_v27 = vld [vmem:[%s804_s1 + $0x98] sm:$0xff]  ;;  %v13_v28 = vld [vmem:[%s804_s1 + $0x10] sm:$0xff] }
   0x8   :  { %v31_v29 = vld [vmem:[%s804_s1 + $0xa0] sm:$0xff]  ;;  %v14_v30 = vld [vmem:[%s804_s1 + $0x18] sm:$0xff]  ;;  %v32_v31 = vld [vmem:[%s804_s1 + $0xa8] sm:$0xff] }
   0x9   :  { %557 = vmatpush3.bf16.msra.mxu0 %v554_v5  ;;  %591 = vmatpush3.bf16.msra.mxu1 %v554_v5  ;;  %v15_v32 = vld [vmem:[%s804_s1 + $0x20] sm:$0xff]  ;;  %v33_v33 = vld [vmem:[%s804_s1 + $0xb0] sm:$0xff]  ;;  %v16_v34 = vld [vmem:[%s804_s1 + $0x28] sm:$0xff] }
   0xa   :  { %559 = vmatprep.subr.bf16.mxu0 %v558_v8  ;;  %584 = vmatprep.subr.bf16.mxu1 %v558_v8  ;;  %v34_v35 = vld [vmem:[%s804_s1 + $0xb8] sm:$0xff]  ;;  %v17_v36 = vld [vmem:[%s804_s1 + $0x30] sm:$0xff]  ;;  %v35_v37 = vld [vmem:[%s804_s1 + $0xc0] sm:$0xff] }
   0xb   :  { %v18_v38 = vld [vmem:[%s804_s1 + $0x38] sm:$0xff]  ;;  %v36_v39 = vld [vmem:[%s804_s1 + $0xc8] sm:$0xff]  ;;  %v19_v40 = vld [vmem:[%s804_s1 + $0x40] sm:$0xff] }
   0xc   :  { %v37_v41 = vld [vmem:[%s804_s1 + $0xd0] sm:$0xff]  ;;  %v20_v42 = vld [vmem:[%s804_s1 + $0x48] sm:$0xff]  ;;  %v38_v43 = vld [vmem:[%s804_s1 + $0xd8] sm:$0xff] }
   0xd   :  { %561 = vmatpush3.bf16.msra.mxu0 %v558_v8  ;;  %592 = vmatpush3.bf16.msra.mxu1 %v558_v8  ;;  %v21_v44 = vld [vmem:[%s804_s1 + $0x50] sm:$0xff]  ;;  %v39_v45 = vld [vmem:[%s804_s1 + $0xe0] sm:$0xff]  ;;  %v22_v46 = vld [vmem:[%s804_s1 + $0x58] sm:$0xff] }
   0xe   :  { %563 = vmatprep.subr.bf16.mxu0 %v562_v13  ;;  %585 = vmatprep.subr.bf16.mxu1 %v562_v13  ;;  %v40_v47 = vld [vmem:[%s804_s1 + $0xe8] sm:$0xff]  ;;  %v23_v48 = vld [vmem:[%s804_s1 + $0x60] sm:$0xff]  ;;  %v41_v49 = vld [vmem:[%s804_s1 + $0xf0] sm:$0xff] }
   0xf   :  { %v24_v50 = vld [vmem:[%s804_s1 + $0x68] sm:$0xff]  ;;  %v42_v51 = vld [vmem:[%s804_s1 + $0xf8] sm:$0xff]  ;;  %v25_v52 = vld [vmem:[%s804_s1 + $0x70] sm:$0xff] }
  0x10   :  { %v43_v53 = vld [vmem:[%s804_s1 + $0x100] sm:$0xff]  ;;  %v26_v54 = vld [vmem:[%s804_s1 + $0x78] sm:$0xff]  ;;  %v44_v55 = vld [vmem:[%s804_s1 + $0x108] sm:$0xff] }
  0x11   :  { %565 = vmatpush3.bf16.msra.mxu0 %v562_v13  ;;  %593 = vmatpush3.bf16.msra.mxu1 %v562_v13  ;;  %v45_v56 = vld [vmem:[%s804_s1 + $0x110] sm:$0xff]  ;;  %v27_v57 = vld [vmem:[%s804_s1 + $0x80] sm:$0xff]  ;;  %v46_v58 = vld [vmem:[%s804_s1 + $0x118] sm:$0xff] }
  0x12   :  { %567 = vmatprep.subr.bf16.mxu0 %v566_v16  ;;  %586 = vmatprep.subr.bf16.mxu1 %v566_v16  ;;  %v28_v59 = vld [vmem:[%s804_s1 + $0x88] sm:$0xff]  ;;  %s608_s1 = smov 9  }
  0x15   :  { %569 = vmatpush3.bf16.msra.mxu0 %v566_v16  ;;  %594 = vmatpush3.bf16.msra.mxu1 %v566_v16 }
  0x16   :  { %571 = vmatprep.subr.bf16.mxu0 %v570_v19  ;;  %587 = vmatprep.subr.bf16.mxu1 %v570_v19 }
  0x19   :  { %573 = vmatpush3.bf16.msra.mxu0 %v570_v19  ;;  %595 = vmatpush3.bf16.msra.mxu1 %v570_v19 }
  0x1a   :  { %575 = vmatprep.subr.bf16.mxu0 %v574_v22  ;;  %588 = vmatprep.subr.bf16.mxu1 %v574_v22 }
  0x1d   :  { %577 = vmatpush3.bf16.msra.mxu0 %v574_v22  ;;  %596 = vmatpush3.bf16.msra.mxu1 %v574_v22 }
  0x1e   :  { %579 = vmatprep.subr.bf16.mxu0 %v578_v25  ;;  %589 = vmatprep.subr.bf16.mxu1 %v578_v25 }
  0x21   :  { %581 = vmatpush3.bf16.msra.mxu0 %v578_v25  ;;  %597 = vmatpush3.bf16.msra.mxu1 %v578_v25 }
  0x24   :  { %497 = vmatmul.mubr.f32.vlgmr.msra.gmra.mrb[0].mxu0 %v12_v26  ;;  %524 = vmatmul.mubr.f32.vlgmr.msra.gmra.mrb[0].mxu1 %v30_v27 }
  0x25   :  { %499 = vmatprep.mubr.f32.mxu0 %v13_v28  ;;  %526 = vmatprep.mubr.f32.mxu1 %v31_v29 }
  0x28   :  { %500 = vmatmul.mubr.f32.gmra.mrb[2].mxu0 %v14_v30  ;;  %527 = vmatmul.mubr.f32.gmra.mrb[2].mxu1 %v32_v31 }
  0x29   :  { %502 = vmatprep.mubr.f32.mxu0 %v15_v32  ;;  %529 = vmatprep.mubr.f32.mxu1 %v33_v33 }
  0x2c   :  { %503 = vmatmul.mubr.f32.gmra.mrb[4].mxu0 %v16_v34  ;;  %530 = vmatmul.mubr.f32.gmra.mrb[4].mxu1 %v34_v35 }
  0x2d   :  { %505 = vmatprep.mubr.f32.mxu0 %v17_v36  ;;  %532 = vmatprep.mubr.f32.mxu1 %v35_v37 }
  0x30   :  { %506 = vmatmul.mubr.f32.gmra.mrb[6].mxu0 %v18_v38  ;;  %533 = vmatmul.mubr.f32.gmra.mrb[6].mxu1 %v36_v39 }
  0x31   :  { %508 = vmatprep.mubr.f32.mxu0 %v19_v40  ;;  %535 = vmatprep.mubr.f32.mxu1 %v37_v41 }
  0x34   :  { %509 = vmatmul.mubr.f32.gmra.mrb[8].mxu0 %v20_v42  ;;  %536 = vmatmul.mubr.f32.gmra.mrb[8].mxu1 %v38_v43 }
  0x35   :  { %511 = vmatprep.mubr.f32.mxu0 %v21_v44  ;;  %538 = vmatprep.mubr.f32.mxu1 %v39_v45 }
  0x38   :  { %512 = vmatmul.mubr.f32.gmra.mrb[10].mxu0 %v22_v46  ;;  %539 = vmatmul.mubr.f32.gmra.mrb[10].mxu1 %v40_v47 }
  0x39   :  { %514 = vmatprep.mubr.f32.mxu0 %v23_v48  ;;  %541 = vmatprep.mubr.f32.mxu1 %v41_v49 }
  0x3c   :  { %515 = vmatmul.mubr.f32.gmra.mrb[12].mxu0 %v24_v50  ;;  %542 = vmatmul.mubr.f32.gmra.mrb[12].mxu1 %v42_v51 }
  0x3d   :  { %517 = vmatprep.mubr.f32.mxu0 %v25_v52  ;;  %544 = vmatprep.mubr.f32.mxu1 %v43_v53 }
  0x40   :  { %518 = vmatmul.mubr.f32.gmra.mrb[14].mxu0 %v26_v54  ;;  %545 = vmatmul.mubr.f32.gmra.mrb[14].mxu1 %v44_v55 }
  0x41   :  { %547 = vmatprep.mubr.f32.mxu1 %v45_v56  ;;  %520 = vmatprep.mubr.f32.mxu0 %v27_v57 }
  0x44   :  { %548 = vmatmul.mubr.f32.gmra.mrb[16].mxu1 %v46_v58  ;;  %521 = vmatmul.mubr.f32.gmra.mrb[16].mxu0 %v28_v59 }
  0xf7   :  { %v498_v60 = vpop.f32.mrb[0].mxu0  ;;  %v785_v61 = vpop.f32.mrb[0].mxu1 }
  0xf8   :  { %310 = vrot.lane.b32.xlu0 %v498_v60, %s606_s26  ;;  %v129_v62 = vpop.f32.mrb[1].mxu0  ;;  %v787_v63 = vpop.f32.mrb[1].mxu1 }
  0xfb   :  { %v501_v0 = vpop.f32.mrb[2].mxu0  ;;  %v528_v1 = vpop.f32.mrb[2].mxu1 }
  0xfc   :  { %308 = vrot.lane.b32.xlu0 %v129_v62, %s606_s26  ;;  %314 = vrot.lane.b32.xlu1 %v501_v0, %s606_s26  ;;  %v139_v2 = vpop.f32.mrb[3].mxu0  ;;  %v229_v3 = vpop.f32.mrb[3].mxu1 }
  0xff   :  { %v504_v4 = vpop.f32.mrb[4].mxu0  ;;  %v531_v5 = vpop.f32.mrb[4].mxu1 }
 0x100   :  { %348 = vrot.lane.b32.xlu0 %v229_v3, %s607_s27  ;;  %350 = vrot.lane.b32.xlu1 %v528_v1, %s607_s27  ;;  %v149_v6 = vpop.f32.mrb[5].mxu0  ;;  %v239_v7 = vpop.f32.mrb[5].mxu1 }
 0x103   :  { %v507_v8 = vpop.f32.mrb[6].mxu0  ;;  %v534_v9 = vpop.f32.mrb[6].mxu1 }
 0x104   :  { %312 = vrot.lane.b32.xlu1 %v139_v2, %s606_s26  ;;  %316 = vrot.lane.b32.xlu0 %v149_v6, %s608_s1  ;;  %v159_v10 = vpop.f32.mrb[7].mxu0  ;;  %v249_v11 = vpop.f32.mrb[7].mxu1 }
 0x107   :  { %v510_v12 = vpop.f32.mrb[8].mxu0  ;;  %v537_v13 = vpop.f32.mrb[8].mxu1 }
 0x108   :  { %318 = vrot.lane.b32.xlu1 %v504_v4, %s608_s1  ;;  %352 = vrot.lane.b32.xlu0 %v239_v7, %s607_s27  ;;  %v169_v14 = vpop.f32.mrb[9].mxu0  ;;  %v259_v15 = vpop.f32.mrb[9].mxu1 }
 0x10b   :  { %v513_v16 = vpop.f32.mrb[10].mxu0  ;;  %v540_v17 = vpop.f32.mrb[10].mxu1 }
 0x10c   :  { %354 = vrot.lane.b32.xlu1 %v531_v5, %s607_s27  ;;  %320 = vrot.lane.b32.xlu0 %v159_v10, %s608_s1  ;;  %v179_v18 = vpop.f32.mrb[11].mxu0  ;;  %v269_v19 = vpop.f32.mrb[11].mxu1 }
 0x10f   :  { %v516_v20 = vpop.f32.mrb[12].mxu0  ;;  %v543_v21 = vpop.f32.mrb[12].mxu1 }
 0x110   :  { %322 = vrot.lane.b32.xlu1 %v507_v8, %s608_s1  ;;  %360 = vrot.lane.b32.xlu0 %v249_v11, %s609_s28  ;;  %v189_v22 = vpop.f32.mrb[13].mxu0  ;;  %v279_v23 = vpop.f32.mrb[13].mxu1 }
 0x113   :  { %v519_v24 = vpop.f32.mrb[14].mxu0  ;;  %v546_v25 = vpop.f32.mrb[14].mxu1 }
 0x114   :  { %362 = vrot.lane.b32.xlu1 %v534_v9, %s609_s28  ;;  %324 = vrot.lane.b32.xlu0 %v169_v14, %s610_s29  ;;  %v199_v26 = vpop.f32.mrb[15].mxu0  ;;  %v289_v27 = vpop.f32.mrb[15].mxu1 }
 0x117   :  { %v549_v28 = vpop.f32.mrb[16].mxu1  ;;  %v522_v29 = vpop.f32.mrb[16].mxu0 }
 0x118   :  { %326 = vrot.lane.b32.xlu1 %v510_v12, %s610_s29  ;;  %364 = vrot.lane.b32.xlu0 %v259_v15, %s609_s28  ;;  %v299_v30 = vpop.f32.mrb[17].mxu1  ;;  %v209_v31 = vpop.f32.mrb[17].mxu0 }
 0x11c   :  { %366 = vrot.lane.b32.xlu1 %v537_v13, %s609_s28  ;;  %328 = vrot.lane.b32.xlu0 %v179_v18, %s610_s29 }
 0x120   :  { %330 = vrot.lane.b32.xlu1 %v513_v16, %s610_s29  ;;  %372 = vrot.lane.b32.xlu0 %v269_v19, %s611_s30 }
 0x124   :  { %374 = vrot.lane.b32.xlu1 %v540_v17, %s611_s30  ;;  %332 = vrot.lane.b32.xlu0 %v189_v22, %s612_s3 }
 0x128   :  { %334 = vrot.lane.b32.xlu1 %v516_v20, %s612_s3  ;;  %376 = vrot.lane.b32.xlu0 %v279_v23, %s611_s30 }
 0x12c   :  { %378 = vrot.lane.b32.xlu1 %v543_v21, %s611_s30  ;;  %336 = vrot.lane.b32.xlu0 %v199_v26, %s612_s3 }
 0x130   :  { %338 = vrot.lane.b32.xlu1 %v519_v24, %s612_s3  ;;  %384 = vrot.lane.b32.xlu0 %v289_v27, %s613_s4 }
 0x134   :  { %386 = vrot.lane.b32.xlu1 %v546_v25, %s613_s4  ;;  %388 = vrot.lane.b32.xlu0 %v299_v30, %s613_s4 }
 0x138   :  { %390 = vrot.lane.b32.xlu1 %v549_v28, %s613_s4 }
 0x16a   :  { %v311_v32 = vpop.permute.xlu0 %310 }
 0x16e   :  { %v309_v33 = vpop.permute.xlu0 %308  ;;  %v315_v34 = vpop.permute.xlu1 %314 }
 0x172   :  { %v349_v35 = vpop.permute.xlu0 %348  ;;  %v351_v36 = vpop.permute.xlu1 %350 }
 0x176   :  { %v313_v37 = vpop.permute.xlu1 %312  ;;  %v317_v38 = vpop.permute.xlu0 %316 }
 0x177   :  { %v344_v62 = vadd.f32 %v317_v38, %v209_v31 }
 0x17a   :  { %v319_v39 = vpop.permute.xlu1 %318  ;;  %v353_v40 = vpop.permute.xlu0 %352 }
 0x17b   :  { %v345_v4 = vadd.f32 %v522_v29, %v319_v39 }
 0x17e   :  { %v355_v41 = vpop.permute.xlu1 %354  ;;  %v321_v42 = vpop.permute.xlu0 %320 }
 0x17f   :  { %v346_v5 = vadd.f32 %v321_v42, %v787_v63 }
 0x182   :  { %v323_v43 = vpop.permute.xlu1 %322  ;;  %v361_v44 = vpop.permute.xlu0 %360 }
 0x183   :  { %v347_v18 = vadd.f32 %v785_v61, %v323_v43 }
 0x186   :  { %v363_v45 = vpop.permute.xlu1 %362  ;;  %v325_v46 = vpop.permute.xlu0 %324 }
 0x187   :  { %v356_v2 = vadd.f32 %v349_v35, %v325_v46 }
 0x18a   :  { %v327_v47 = vpop.permute.xlu1 %326  ;;  %v365_v48 = vpop.permute.xlu0 %364 }
 0x18b   :  { %v357_v14 = vadd.f32 %v351_v36, %v327_v47 }
 0x18e   :  { %v367_v49 = vpop.permute.xlu1 %366  ;;  %v329_v50 = vpop.permute.xlu0 %328 }
 0x18f   :  { %v358_v15 = vadd.f32 %v353_v40, %v329_v50 }
 0x192   :  { %v331_v51 = vpop.permute.xlu1 %330  ;;  %v373_v52 = vpop.permute.xlu0 %372 }
 0x193   :  { %v380_v3 = vadd.f32 %v373_v52, %v344_v62  ;;  %v359_v25 = vadd.f32 %v355_v41, %v331_v51 }
 0x196   :  { %v375_v53 = vpop.permute.xlu1 %374  ;;  %v333_v54 = vpop.permute.xlu0 %332 }
 0x197   :  { %v340_v57 = vadd.f32 %v333_v54, %v309_v33  ;;  %v381_v13 = vadd.f32 %v375_v53, %v345_v4 }
 0x199   :  { %v368_v0 = vadd.f32 %v361_v44, %v340_v57 }
 0x19a   :  { %v335_v55 = vpop.permute.xlu1 %334  ;;  %v377_v56 = vpop.permute.xlu0 %376 }
 0x19b   :  { %v341_v58 = vadd.f32 %v335_v55, %v311_v32  ;;  %v396_v12 = vadd.f32 %v380_v3, %v368_v0  ;;  %v382_v16 = vadd.f32 %v377_v56, %v346_v5 }
 0x19d   :  { %v369_v6 = vadd.f32 %v363_v45, %v341_v58 }
 0x19e   :  { %v379_v59 = vpop.permute.xlu1 %378  ;;  %v337_v60 = vpop.permute.xlu0 %336 }
 0x19f   :  { %v342_v1 = vadd.f32 %v337_v60, %v313_v37  ;;  %v397_v20 = vadd.f32 %v381_v13, %v369_v6  ;;  %v383_v26 = vadd.f32 %v379_v59, %v347_v18 }
 0x1a1   :  { %v370_v9 = vadd.f32 %v365_v48, %v342_v1 }
 0x1a2   :  { %v339_v7 = vpop.permute.xlu1 %338  ;;  %v385_v8 = vpop.permute.xlu0 %384 }
 0x1a3   :  { %v343_v10 = vadd.f32 %v339_v7, %v315_v34  ;;  %v392_v11 = vadd.f32 %v385_v8, %v356_v2  ;;  %v398_v23 = vadd.f32 %v382_v16, %v370_v9 }
 0x1a5   :  { %v400_v17 = vadd.f32 %v396_v12, %v392_v11  ;;  %v371_v22 = vadd.f32 %v367_v49, %v343_v10 }
 0x1a6   :  { %v387_v19 = vpop.permute.xlu1 %386  ;;  %v389_v21 = vpop.permute.xlu0 %388 }
 0x1a7   :  { %404 = vst [vmem:[%s805_s2] sm:$0xff] %v400_v17  ;;  %v393_v63 = vadd.f32 %v387_v19, %v357_v14  ;;  %v394_v24 = vadd.f32 %v389_v21, %v358_v15  ;;  %v399_v61 = vadd.f32 %v383_v26, %v371_v22 }
 0x1a9   :  { %v401_v27 = vadd.f32 %v397_v20, %v393_v63  ;;  %v402_v28 = vadd.f32 %v398_v23, %v394_v24 }
 0x1aa   :  { %v391_v29 = vpop.permute.xlu1 %390 }
 0x1ab   :  { %405 = vst [vmem:[%s805_s2 + $0x8] sm:$0xff] %v401_v27  ;;  %406 = vst [vmem:[%s805_s2 + $0x10] sm:$0xff] %v402_v28  ;;  %v395_v30 = vadd.f32 %v391_v29, %v359_v25 }
 0x1ad   :  { %v403_v31 = vadd.f32 %v399_v61, %v395_v30 }
 0x1af   :  { %407 = vst [vmem:[%s805_s2 + $0x18] sm:$0xff] %v403_v31 }

</bundles_post_ra>
